<compile_context>
chip_gen: v5e
topology: v5e:2x2
jax: 0.10.0
libtpu: 0.0.40
codegen_flags: <defaults>
</compile_context>

<pallas_src>
import jax
import jax.numpy as jnp
from jax.experimental import pallas as pl
from jax.experimental.pallas import tpu as pltpu


def _round_up(v, m):
    return ((v + m - 1) // m) * m


def _make_cross_kernel(num_layers, use_mxu):
    """num_layers is a small static int -> unrolled Python loop in the kernel."""
    if use_mxu:
        def kernel(x_ref, w_ref, b_ref, out_ref):
            # x_ref: (TB, Dp) input dtype; w_ref: (L, Dp, Dp) f32; b_ref: (L, Dp) f32
            x = x_ref[...].astype(jnp.float32)
            for i in range(num_layers):                    # static unroll
                # Re-read x0 from the already-resident input buffer instead of
                # keeping a second full-tile value live across the whole loop.
                x0 = x_ref[...].astype(jnp.float32)
                # Block-diagonal rank-1 matmul: segmented reduce AND broadcast
                # in a single MXU op; segment j of the result is <x_j, w_i>.
                xw = jnp.dot(x, w_ref[i], preferred_element_type=jnp.float32)
                x = x0 * xw + b_ref[pl.ds(i, 1), :] + x
            out_ref[...] = x.astype(out_ref.dtype)
    else:
        def kernel(x_ref, w_ref, b_ref, out_ref):
            # Generic fallback (D neither a divisor of 128 nor a multiple of it).
            x = x_ref[...].astype(jnp.float32)
            for i in range(num_layers):
                x0 = x_ref[...].astype(jnp.float32)
                w_i = w_ref[pl.ds(i, 1), :]                       # (1, D)
                xw = jnp.sum(x * w_i, axis=-1, keepdims=True)     # (TB, 1) XLU reduce
                x = x0 * xw + b_ref[pl.ds(i, 1), :] + x
            out_ref[...] = x.astype(out_ref.dtype)
    return kernel


def cross_network_forward(x, w, b, *, block_rows=None,
                          block_bytes=4 * 1024 * 1024):
    """Pallas implementation of CrossNetwork.forward.

    x: (..., input_dim); typically (batch, num_fields, embed_dim).
    w: (num_layers, input_dim) -- row i is self.w[i].weight.view(-1)
    b: (num_layers, input_dim) -- row i is self.b[i]
    Returns an array with x's shape and dtype.
    """
    orig_shape = x.shape
    orig_dtype = x.dtype
    D = orig_shape[-1]
    L = w.shape[0]

    x2 = x.reshape(-1, D)                    # HBM traffic stays in input dtype
    rows = x2.shape[0]

    # Lane packing / MXU path selection.
    if D < 128 and 128 % D == 0:
        P, use_mxu = 128 // D, True          # pack P rows per 128-lane row
    elif D % 128 == 0 and L * D * D * 4 <= 8 * 1024 * 1024:
        P, use_mxu = 1, True                 # direct (L, D, D) rank-1 operand
    else:
        P, use_mxu = 1, False                # generic lane-reduce fallback
    Dp = P * D

    if P > 1:
        rows_p = _round_up(rows, P)
        if rows_p != rows:                   # tiny pad (< P rows), rare
            x2 = jnp.pad(x2, ((0, rows_p - rows), (0, 0)))
        xk = x2.reshape(rows_p // P, Dp)     # contiguous reshape (free)
        packed_rows = rows_p // P
    else:
        rows_p = rows
        xk = x2
        packed_rows = rows

    # Tiny parameter operands, resident in VMEM across the whole grid.
    if use_mxu:
        ones_row = jnp.ones((1, D), jnp.float32)
        eye_p = jnp.eye(P, dtype=jnp.float32)
        # Layer i operand: block-diag(P blocks of outer(w_i, ones(D))).
        w_op = jnp.stack([
            jnp.kron(eye_p, w[i].astype(jnp.float32)[:, None] * ones_row)
            for i in range(L)
        ])                                                   # (L, Dp, Dp)
        b_op = jnp.tile(b.astype(jnp.float32), (1, P))       # (L, Dp)
        w_spec = pl.BlockSpec((L, Dp, Dp), lambda i: (0, 0, 0))
    else:
        w_op = w.astype(jnp.float32)                         # (L, D)
        b_op = b.astype(jnp.float32)                         # (L, D)
        w_spec = pl.BlockSpec((L, Dp), lambda i: (0, 0))

    # Batch-row block: sized by bytes (f32 intermediates dominate VMEM),
    # rounded to the 8-row sublane granule; full-array block for small inputs.
    row_bytes = Dp * 4
    if block_rows is None:
        tb = max(8, (block_bytes // max(1, row_bytes)) // 8 * 8)
    else:
        tb = max(8, (block_rows // 8) * 8)
    if tb >= packed_rows:
        tb = packed_rows                     # single block == full array dim (legal)
    else:
        # Keep >= ~8 grid steps (v7x: 2 TCs share the "parallel" axis) as long
        # as each block still carries >= ~1 MiB.
        min_steps = 8
        tb_steps = _round_up(-(-packed_rows // min_steps), 8)
        if tb_steps * row_bytes >= (1 << 20):
            tb = min(tb, tb_steps)

    kernel = _make_cross_kernel(L, use_mxu)
    out = pl.pallas_call(
        kernel,
        out_shape=jax.ShapeDtypeStruct((packed_rows, Dp), orig_dtype),
        grid_spec=pltpu.PrefetchScalarGridSpec(
            num_scalar_prefetch=0,
            grid=(pl.cdiv(packed_rows, tb),),
            in_specs=[
                pl.BlockSpec((tb, Dp), lambda i: (i, 0)),    # lane-dense row slab
                w_spec,                                      # resident layer weights
                pl.BlockSpec((L, Dp), lambda i: (0, 0)),     # resident layer biases
            ],
            out_specs=pl.BlockSpec((tb, Dp), lambda i: (i, 0)),
        ),
        compiler_params=pltpu.CompilerParams(
            dimension_semantics=("parallel",),               # independent row blocks
            vmem_limit_bytes=48 * 1024 * 1024,               # safe on v7x (64 MiB phys)
        ),
    )(xk, w_op, b_op)

    if P > 1:
        out = out.reshape(rows_p, D)
        if rows_p != rows:
            out = out[:rows]
    return out.reshape(orig_shape)


def cross_network_ref(x, w, b):
    """Pure-JAX reference mirroring the PyTorch forward exactly."""
    x0 = x
    out = x
    for i in range(w.shape[0]):
        xw = jnp.sum(out * w[i], axis=-1, keepdims=True)   # Linear(input_dim, 1, bias=False)
        out = x0 * xw + b[i] + out
    return out


if __name__ == "__main__":
    key = jax.random.PRNGKey(0)
    k1, k2, k3, k4, k5, k6 = jax.random.split(key, 6)

    # Case 1: typical DCN shapes, D=32 < 128 -> packed block-diagonal MXU path.
    batch, num_fields, input_dim, num_layers = 2, 4, 32, 3
    x = jax.random.normal(k1, (batch, num_fields, input_dim), dtype=jnp.float32)
    w = jax.random.normal(k2, (num_layers, input_dim), dtype=jnp.float32) * 0.1
    b = jax.random.normal(k3, (num_layers, input_dim), dtype=jnp.float32) * 0.1

    out = jax.block_until_ready(cross_network_forward(x, w, b))
    ref = cross_network_ref(x, w, b)
    assert out.shape == x.shape and out.dtype == x.dtype
    # Loose-ish tolerance: the per-layer dot may run as MXU bf16 passes.
    assert jnp.allclose(out, ref, rtol=2e-2, atol=2e-2), (out, ref)

    # Case 2: D=48 (neither a divisor nor a multiple of 128) -> generic
    # lane-reduce fallback path; pure f32 VPU math -> tight tolerance.
    x2 = jax.random.normal(k4, (2, 3, 48), dtype=jnp.float32)
    w2 = jax.random.normal(k5, (2, 48), dtype=jnp.float32) * 0.1
    b2 = jax.random.normal(k6, (2, 48), dtype=jnp.float32) * 0.1
    out2 = jax.block_until_ready(cross_network_forward(x2, w2, b2))
    ref2 = cross_network_ref(x2, w2, b2)
    assert out2.shape == x2.shape
    assert jnp.allclose(out2, ref2, rtol=1e-4, atol=1e-4), (out2, ref2)

    print("KERNEL_OK")
</pallas_src>

<mosaic_0001>
module attributes {stable_mosaic.version = 11 : i64} {
  func.func @kernel(%arg0: i32, %arg1: memref<2x128xf32, #tpu.memory_space<vmem>>, %arg2: memref<3x128x128xf32, #tpu.memory_space<vmem>>, %arg3: memref<3x128xf32, #tpu.memory_space<vmem>>, %arg4: memref<2x128xf32, #tpu.memory_space<vmem>>) attributes {dimension_semantics = [#tpu.dimension_semantics<parallel>], iteration_bounds = array<i64: 1>, scalar_prefetch = 0 : i64, scratch_operands = 0 : i64, tpu.core_type = #tpu.core_type<tc>, window_params = [{transform_indices = @transform_0, window_bounds = array<i64: 2, 128>}, {pipeline_mode = #tpu.pipeline_mode<synchronous>, transform_indices = @transform_1, window_bounds = array<i64: 3, 128, 128>}, {pipeline_mode = #tpu.pipeline_mode<synchronous>, transform_indices = @transform_2, window_bounds = array<i64: 3, 128>}, {transform_indices = @transform_3, window_bounds = array<i64: 2, 128>}]} {
    %c0 = arith.constant 0 : index
    %c0_0 = arith.constant 0 : index
    %0 = vector.load %arg1[%c0, %c0_0] : memref<2x128xf32, #tpu.memory_space<vmem>>, vector<2x128xf32>
    %c0_1 = arith.constant 0 : index
    %c0_2 = arith.constant 0 : index
    %1 = vector.load %arg1[%c0_1, %c0_2] : memref<2x128xf32, #tpu.memory_space<vmem>>, vector<2x128xf32>
    %c0_3 = arith.constant 0 : index
    %c0_4 = arith.constant 0 : index
    %c0_5 = arith.constant 0 : index
    %2 = vector.load %arg2[%c0_3, %c0_4, %c0_5] : memref<3x128x128xf32, #tpu.memory_space<vmem>>, vector<1x128x128xf32>
    %3 = vector.shape_cast %2 : vector<1x128x128xf32> to vector<128x128xf32>
    %cst = arith.constant dense<0.000000e+00> : vector<2x128xf32>
    %4 = tpu.matmul %0, %3, %cst {dimension_numbers = #tpu.dot_dimension_numbers<[1], [0], [0], [1], [0, 0, 1, 1], [], []>} : vector<2x128xf32>, vector<128x128xf32>, vector<2x128xf32> -> vector<2x128xf32>
    %5 = arith.mulf %1, %4 : vector<2x128xf32>
    %c0_6 = arith.constant 0 : index
    %c0_7 = arith.constant 0 : index
    %6 = vector.load %arg3[%c0_6, %c0_7] : memref<3x128xf32, #tpu.memory_space<vmem>>, vector<1x128xf32>
    %7 = vector.broadcast %6 : vector<1x128xf32> to vector<2x128xf32>
    %8 = arith.addf %5, %7 : vector<2x128xf32>
    %9 = arith.addf %8, %0 : vector<2x128xf32>
    %c0_8 = arith.constant 0 : index
    %c0_9 = arith.constant 0 : index
    %10 = vector.load %arg1[%c0_8, %c0_9] : memref<2x128xf32, #tpu.memory_space<vmem>>, vector<2x128xf32>
    %c1 = arith.constant 1 : index
    %c0_10 = arith.constant 0 : index
    %c0_11 = arith.constant 0 : index
    %11 = vector.load %arg2[%c1, %c0_10, %c0_11] : memref<3x128x128xf32, #tpu.memory_space<vmem>>, vector<1x128x128xf32>
    %12 = vector.shape_cast %11 : vector<1x128x128xf32> to vector<128x128xf32>
    %cst_12 = arith.constant dense<0.000000e+00> : vector<2x128xf32>
    %13 = tpu.matmul %9, %12, %cst_12 {dimension_numbers = #tpu.dot_dimension_numbers<[1], [0], [0], [1], [0, 0, 1, 1], [], []>} : vector<2x128xf32>, vector<128x128xf32>, vector<2x128xf32> -> vector<2x128xf32>
    %14 = arith.mulf %10, %13 : vector<2x128xf32>
    %c1_13 = arith.constant 1 : index
    %c0_14 = arith.constant 0 : index
    %15 = vector.load %arg3[%c1_13, %c0_14] : memref<3x128xf32, #tpu.memory_space<vmem>>, vector<1x128xf32>
    %16 = vector.broadcast %15 : vector<1x128xf32> to vector<2x128xf32>
    %17 = arith.addf %14, %16 : vector<2x128xf32>
    %18 = arith.addf %17, %9 : vector<2x128xf32>
    %c0_15 = arith.constant 0 : index
    %c0_16 = arith.constant 0 : index
    %19 = vector.load %arg1[%c0_15, %c0_16] : memref<2x128xf32, #tpu.memory_space<vmem>>, vector<2x128xf32>
    %c2 = arith.constant 2 : index
    %c0_17 = arith.constant 0 : index
    %c0_18 = arith.constant 0 : index
    %20 = vector.load %arg2[%c2, %c0_17, %c0_18] : memref<3x128x128xf32, #tpu.memory_space<vmem>>, vector<1x128x128xf32>
    %21 = vector.shape_cast %20 : vector<1x128x128xf32> to vector<128x128xf32>
    %cst_19 = arith.constant dense<0.000000e+00> : vector<2x128xf32>
    %22 = tpu.matmul %18, %21, %cst_19 {dimension_numbers = #tpu.dot_dimension_numbers<[1], [0], [0], [1], [0, 0, 1, 1], [], []>} : vector<2x128xf32>, vector<128x128xf32>, vector<2x128xf32> -> vector<2x128xf32>
    %23 = arith.mulf %19, %22 : vector<2x128xf32>
    %c2_20 = arith.constant 2 : index
    %c0_21 = arith.constant 0 : index
    %24 = vector.load %arg3[%c2_20, %c0_21] : memref<3x128xf32, #tpu.memory_space<vmem>>, vector<1x128xf32>
    %25 = vector.broadcast %24 : vector<1x128xf32> to vector<2x128xf32>
    %26 = arith.addf %23, %25 : vector<2x128xf32>
    %27 = arith.addf %26, %18 : vector<2x128xf32>
    %c0_22 = arith.constant 0 : index
    %c0_23 = arith.constant 0 : index
    %28 = vector.load %arg4[%c0_22, %c0_23] : memref<2x128xf32, #tpu.memory_space<vmem>>, vector<2x128xf32>
    tpu.vector_store %arg4[%c0_22, %c0_23], %27 {strides = array<i32>} : memref<2x128xf32, #tpu.memory_space<vmem>>, vector<2x128xf32>,
    return
  }
  func.func @transform_0(%arg0: i32) -> (i32, i32) {
    %c0_i32 = arith.constant 0 : i32
    %c0_i32_0 = arith.constant 0 : i32
    return %arg0, %c0_i32 : i32, i32
  }
  func.func @transform_1(%arg0: i32) -> (i32, i32, i32) {
    %c0_i32 = arith.constant 0 : i32
    %c0_i32_0 = arith.constant 0 : i32
    %c0_i32_1 = arith.constant 0 : i32
    %c0_i32_2 = arith.constant 0 : i32
    return %c0_i32, %c0_i32_0, %c0_i32_1 : i32, i32, i32
  }
  func.func @transform_2(%arg0: i32) -> (i32, i32) {
    %c0_i32 = arith.constant 0 : i32
    %c0_i32_0 = arith.constant 0 : i32
    %c0_i32_1 = arith.constant 0 : i32
    return %c0_i32, %c0_i32_0 : i32, i32
  }
  func.func @transform_3(%arg0: i32) -> (i32, i32) {
    %c0_i32 = arith.constant 0 : i32
    %c0_i32_0 = arith.constant 0 : i32
    return %arg0, %c0_i32 : i32, i32
  }
}

</mosaic_0001>

<bundles_post_ra>
// kernel: tpu_custom_call.1
= control target key start
LH: loop header
LB: loop body
LE: loop exit
PB: predicated region body
PF: predicated region fallthrough
CT: control target
= control target key end

     0   :  { %8 = vsyncpa [#allocation3], 0  ;;  %s352_s0 = inlined_call_operand.hbm [shape: f32[2,128], index: 0, kind: input, shape index: {}]   ;;  %s353_s1 = inlined_call_operand.hbm [shape: f32[3,128,128], index: 1, kind: input, shape index: {}]   ;;  %s354_s2 = inlined_call_operand.hbm [shape: f32[3,128], index: 2, kind: input, shape index: {}]   ;;  %s355_s3 = inlined_call_operand.hbm [shape: f32[2,128], index: 3, kind: output, shape index: {}]  }
   0x1   :  { %9 = vsyncpa [#allocation6], 0  ;;  %s26_s14 = sshll.u32 %s353_s1, 4  ;;  %s27_s14 = int_to_ptr.hbm [resolvable:$true] %s26_s14 }
   0x2   :  { %10 = vsyncpa [#allocation4], 0  ;;  %s314_s15 = smov [#allocation5]   ;;  %s16_s19 = sshll.u32 %s352_s0, 4  ;;  %s17_s19 = int_to_ptr.hbm [resolvable:$true] %s16_s19 }
   0x3   :  { %s28_s16 = sshll.u32 %s314_s15, 4  ;;  %s315_s20 = smov 128   ;;  %s29_s16 = int_to_ptr.vmem [resolvable:$true] %s28_s16 }
   0x4   :  { %s316_s21 = smov 8   ;;  %s317_s22 = smov [#allocation2]  }
   0x5   :  { %34 = dma.hbm_to_vmem [thread:$0]  %s27_s14, 6144, %s29_s16, [#allocation6], %s315_s20, %s315_s20, %s316_s21  }
   0x6   :  { %s18_s23 = sshll.u32 %s317_s22, 4  ;;  %s40_s26 = sshll.u32 %s354_s2, 4  ;;  %s19_s23 = int_to_ptr.vmem [resolvable:$true] %s18_s23  ;;  %s41_s26 = int_to_ptr.hbm [resolvable:$true] %s40_s26 }
   0x7   :  { %21 = dma.hbm_to_vmem [thread:$0]  %s17_s19, 32, %s19_s23, [#allocation3]  }
   0x8   :  { %s318_s1 = smov [#allocation7]  }
   0x9   :  { %s42_s27 = sshll.u32 %s318_s1, 4  ;;  %s43_s27 = int_to_ptr.vmem [resolvable:$true] %s42_s27 }
   0xa   :  { %45 = dma.hbm_to_vmem [thread:$0]  %s41_s26, 64, %s43_s27, [#allocation6]  }
   0xb   :  { %308 = dma.done.wait [#allocation3], 32  }
   0xc   :  { %309 = vsyncadd [#allocation3], 4294967264 }
   0xd   :  { %310 = dma.done.wait [#allocation6], 6208  }
   0xe   :  { %311 = vsyncadd [#allocation6], 4294961088  ;;  %v74_v0 = vld [vmem:[#allocation5 + $0x78] sm:$0xff]  ;;  %v73_v1 = vld [vmem:[#allocation5 + $0x70] sm:$0xff]  ;;  %s319_s0 = smov [#allocation8]   ;;  %s192_s30 = sshll.u32 %s355_s3, 4  ;;  %s193_s30 = int_to_ptr.hbm [resolvable:$true] %s192_s30 }
   0xf   :  { %75 = vmatpush.msra.mxu0 %v74_v0  ;;  %v72_v2 = vld [vmem:[#allocation5 + $0x68] sm:$0xff]  ;;  %v71_v3 = vld [vmem:[#allocation5 + $0x60] sm:$0xff]  ;;  %v116_v4 = vld [vmem:[#allocation5 + $0xf8] sm:$0xff]  ;;  %s190_s2 = sshll.u32 %s319_s0, 4  ;;  %s191_s2 = int_to_ptr.vmem [resolvable:$true] %s190_s2 }
  0x10   :  { %v70_v5 = vld [vmem:[#allocation5 + $0x58] sm:$0xff]  ;;  %117 = vmatpush.msra.mxu1 %v116_v4  ;;  %v115_v6 = vld [vmem:[#allocation5 + $0xf0] sm:$0xff]  ;;  %v114_v7 = vld [vmem:[#allocation5 + $0xe8] sm:$0xff] }
  0x11   :  { %76 = vmatpush.msra.mxu0 %v73_v1  ;;  %v69_v8 = vld [vmem:[#allocation5 + $0x50] sm:$0xff]  ;;  %v113_v9 = vld [vmem:[#allocation5 + $0xe0] sm:$0xff]  ;;  %v68_v10 = vld [vmem:[#allocation5 + $0x48] sm:$0xff] }
  0x12   :  { %118 = vmatpush.msra.mxu1 %v115_v6  ;;  %v112_v11 = vld [vmem:[#allocation5 + $0xd8] sm:$0xff]  ;;  %v67_v12 = vld [vmem:[#allocation5 + $0x40] sm:$0xff]  ;;  %v111_v13 = vld [vmem:[#allocation5 + $0xd0] sm:$0xff] }
  0x13   :  { %77 = vmatpush.msra.mxu0 %v72_v2  ;;  %v66_v14 = vld [vmem:[#allocation5 + $0x38] sm:$0xff]  ;;  %v110_v15 = vld [vmem:[#allocation5 + $0xc8] sm:$0xff]  ;;  %v65_v16 = vld [vmem:[#allocation5 + $0x30] sm:$0xff] }
  0x14   :  { %119 = vmatpush.msra.mxu1 %v114_v7  ;;  %v109_v17 = vld [vmem:[#allocation5 + $0xc0] sm:$0xff]  ;;  %v64_v18 = vld [vmem:[#allocation5 + $0x28] sm:$0xff]  ;;  %v108_v19 = vld [vmem:[#allocation5 + $0xb8] sm:$0xff] }
  0x15   :  { %78 = vmatpush.msra.mxu0 %v71_v3  ;;  %v63_v20 = vld [vmem:[#allocation5 + $0x20] sm:$0xff]  ;;  %v107_v21 = vld [vmem:[#allocation5 + $0xb0] sm:$0xff]  ;;  %v62_v22 = vld [vmem:[#allocation5 + $0x18] sm:$0xff] }
  0x16   :  { %120 = vmatpush.msra.mxu1 %v113_v9  ;;  %v106_v23 = vld [vmem:[#allocation5 + $0xa8] sm:$0xff]  ;;  %v61_v24 = vld [vmem:[#allocation5 + $0x10] sm:$0xff]  ;;  %v105_v25 = vld [vmem:[#allocation5 + $0xa0] sm:$0xff] }
  0x17   :  { %79 = vmatpush.msra.mxu0 %v70_v5  ;;  %v60_v26 = vld [vmem:[#allocation5 + $0x8] sm:$0xff]  ;;  %v59_v27 = vld [vmem:[#allocation5] sm:$0xff]  ;;  %v58_v28 = vld [vmem:[#allocation2] sm:$0x3] }
  0x18   :  { %121 = vmatpush.msra.mxu1 %v112_v11  ;;  %v104_v29 = vld [vmem:[#allocation5 + $0x98] sm:$0xff]  ;;  %v103_v30 = vld [vmem:[#allocation5 + $0x90] sm:$0xff]  ;;  %v102_v31 = vld [vmem:[#allocation5 + $0x88] sm:$0xff] }
  0x19   :  { %80 = vmatpush.msra.mxu0 %v69_v8  ;;  %v101_v32 = vld [vmem:[#allocation5 + $0x80] sm:$0xff]  ;;  %v158_v33 = vld [vmem:[#allocation5 + $0x178] sm:$0xff]  ;;  %v157_v34 = vld [vmem:[#allocation5 + $0x170] sm:$0xff] }
  0x1a   :  { %122 = vmatpush.msra.mxu1 %v111_v13  ;;  %159 = vmatpush.msra.mxu2 %v158_v33  ;;  %v156_v35 = vld [vmem:[#allocation5 + $0x168] sm:$0xff]  ;;  %v155_v36 = vld [vmem:[#allocation5 + $0x160] sm:$0xff]  ;;  %v154_v37 = vld [vmem:[#allocation5 + $0x158] sm:$0xff] }
  0x1b   :  { %81 = vmatpush.msra.mxu0 %v68_v10  ;;  %v153_v38 = vld [vmem:[#allocation5 + $0x150] sm:$0xff]  ;;  %v152_v39 = vld [vmem:[#allocation5 + $0x148] sm:$0xff]  ;;  %v151_v40 = vld [vmem:[#allocation5 + $0x140] sm:$0xff] }
  0x1c   :  { %123 = vmatpush.msra.mxu1 %v110_v15  ;;  %160 = vmatpush.msra.mxu2 %v157_v34  ;;  %v150_v41 = vld [vmem:[#allocation5 + $0x138] sm:$0xff]  ;;  %v149_v42 = vld [vmem:[#allocation5 + $0x130] sm:$0xff]  ;;  %v148_v43 = vld [vmem:[#allocation5 + $0x128] sm:$0xff] }
  0x1d   :  { %82 = vmatpush.msra.mxu0 %v67_v12  ;;  %v147_v44 = vld [vmem:[#allocation5 + $0x120] sm:$0xff]  ;;  %v146_v50 = vld [vmem:[#allocation5 + $0x118] sm:$0xff]  ;;  %v145_v51 = vld [vmem:[#allocation5 + $0x110] sm:$0xff] }
  0x1e   :  { %124 = vmatpush.msra.mxu1 %v109_v17  ;;  %161 = vmatpush.msra.mxu2 %v156_v35  ;;  %v209_v45 = vld [vmem:[#allocation7] ss:$0 sm:$0xff]  ;;  %v144_v52 = vld [vmem:[#allocation5 + $0x108] sm:$0xff]  ;;  %v210_v54 = vld [vmem:[#allocation7 + $0x1] ss:$0 sm:$0xff] }
  0x1f   :  { %83 = vmatpush.msra.mxu0 %v66_v14  ;;  %v143_v53 = vld [vmem:[#allocation5 + $0x100] sm:$0xff] }
  0x20   :  { %125 = vmatpush.msra.mxu1 %v108_v19  ;;  %162 = vmatpush.msra.mxu2 %v155_v36  ;;  %v211_v59 = vld [vmem:[#allocation7 + $0x2] ss:$0 sm:$0xff] }
  0x21   :  { %84 = vmatpush.msra.mxu0 %v65_v16 }
  0x22   :  { %126 = vmatpush.msra.mxu1 %v107_v21  ;;  %163 = vmatpush.msra.mxu2 %v154_v37 }
  0x23   :  { %85 = vmatpush.msra.mxu0 %v64_v18 }
  0x24   :  { %127 = vmatpush.msra.mxu1 %v106_v23  ;;  %164 = vmatpush.msra.mxu2 %v153_v38 }
  0x25   :  { %86 = vmatpush.msra.mxu0 %v63_v20 }
  0x26   :  { %128 = vmatpush.msra.mxu1 %v105_v25  ;;  %165 = vmatpush.msra.mxu2 %v152_v39 }
  0x27   :  { %87 = vmatpush.msra.mxu0 %v62_v22 }
  0x28   :  { %129 = vmatpush.msra.mxu1 %v104_v29  ;;  %166 = vmatpush.msra.mxu2 %v151_v40 }
  0x29   :  { %88 = vmatpush.msra.mxu0 %v61_v24 }
  0x2a   :  { %130 = vmatpush.msra.mxu1 %v103_v30  ;;  %167 = vmatpush.msra.mxu2 %v150_v41 }
  0x2b   :  { %89 = vmatpush.msra.mxu0 %v60_v26 }
  0x2c   :  { %131 = vmatpush.msra.mxu1 %v102_v31  ;;  %168 = vmatpush.msra.mxu2 %v149_v42 }
  0x2d   :  { %90 = vmatpush.msra.mxu0 %v59_v27 }
  0x2e   :  { %91 = vmatmul.f32.vlgmr.msra.gmra.mxu0 %v58_v28  ;;  %132 = vmatpush.msra.mxu1 %v101_v32 }
  0x2f   :  { %169 = vmatpush.msra.mxu2 %v148_v43 }
  0x31   :  { %170 = vmatpush.msra.mxu2 %v147_v44 }
  0x33   :  { %171 = vmatpush.msra.mxu2 %v146_v50 }
  0x35   :  { %172 = vmatpush.msra.mxu2 %v145_v51 }
  0x37   :  { %173 = vmatpush.msra.mxu2 %v144_v52 }
  0x39   :  { %174 = vmatpush.msra.mxu2 %v143_v53 }
  0xab   :  { %v92_v46 = vpop.f32.mrf.mxu0 }
  0xac   :  { %v95_v47 = vmul.f32 %v92_v46, %v58_v28 }
  0xae   :  { %v98_v48 = vadd.f32 %v209_v45, %v95_v47 }
  0xb0   :  { %v99_v49 = vadd.f32 %v98_v48, %v58_v28 }
  0xb2   :  { %133 = vmatmul.f32.vlgmr.msra.gmra.mxu1 %v99_v49 }
 0x12f   :  { %v134_v55 = vpop.f32.mrf.mxu1 }
 0x130   :  { %v137_v56 = vmul.f32 %v134_v55, %v58_v28 }
 0x132   :  { %v140_v57 = vadd.f32 %v210_v54, %v137_v56 }
 0x134   :  { %v141_v58 = vadd.f32 %v140_v57, %v99_v49 }
 0x136   :  { %175 = vmatmul.f32.vlgmr.msra.gmra.mxu2 %v141_v58 }
 0x1b9   :  { %v176_v60 = vpop.f32.mrf.mxu2 }
 0x1ba   :  { %v179_v61 = vmul.f32 %v176_v60, %v58_v28 }
 0x1bc   :  { %v182_v62 = vadd.f32 %v211_v59, %v179_v61 }
 0x1be   :  { %v183_v63 = vadd.f32 %v182_v62, %v141_v58 }
 0x1c0   :  { %184 = vst [vmem:[#allocation8] sm:$0x3] %v183_v63 }
 0x1c1   :  { %195 = dma.vmem_to_hbm [thread:$0]  %s191_s2, 32, %s193_s30, [#allocation4]  }
 0x1c2   :  { %312 = dma.done.wait [#allocation4], 32  }
 0x1c3   :  { %313 = vsyncadd [#allocation4], 4294967264 }
 0x1c4   :  { %200 = vsyncpa [#allocation3], 1 }
 0x1c5   :  { %201 = vsyncpa [#allocation6], 1 }
 0x1c6   :  { %202 = vsyncpa [#allocation4], 1 }

</bundles_post_ra>
